<compile_context>
chip_gen: v6e
topology: v6e:2x2x1
jax: 0.10.0
libtpu: 0.0.40
codegen_flags: <defaults>
</compile_context>

<pallas_src>
import jax
import jax.numpy as jnp
from jax.experimental import pallas as pl
from jax.experimental.pallas import tpu as pltpu  # noqa: F401  (TPU backend clarity)


def linear_k2_kernel(x_ref, wb_ref, o_ref):
    # out[n, m] = x[n,0]*W[0,m] + x[n,1]*W[1,m] + b[m]
    x0 = x_ref[:, 0:1]            # (N, 1)
    x1 = x_ref[:, 1:2]            # (N, 1)
    w0 = wb_ref[0:1, :]           # (1, M)  row 0 of packed operand
    w1 = wb_ref[1:2, :]           # (1, M)  row 1
    b = wb_ref[2:3, :]            # (1, M)  row 2 = bias
    o_ref[...] = (x0 * w0 + x1 * w1 + b).astype(o_ref.dtype)


def pallas_linear_k2(x2d, wb):
    """x2d: (N, 2) f32, wb: (3, M) f32 (rows 0-1 = W_io, row 2 = bias) -> (N, M)."""
    N, K = x2d.shape
    KB, M = wb.shape
    assert K == 2 and KB == 3
    # Single-block kernel: 36 MACs is far below one VPU pass; block shapes equal
    # the full array dims, satisfying the (8, 128) divisibility rule.
    return pl.pallas_call(
        linear_k2_kernel,
        out_shape=jax.ShapeDtypeStruct((N, M), x2d.dtype),
        in_specs=[
            pl.BlockSpec((N, K), lambda: (0, 0)),
            pl.BlockSpec((KB, M), lambda: (0, 0)),
        ],
        out_specs=pl.BlockSpec((N, M), lambda: (0, 0)),
        cost_estimate=pl.CostEstimate(
            flops=2 * N * K * M,
            transcendentals=0,
            bytes_accessed=(N * K + KB * M + N * M) * 4,
        ),
    )(x2d, wb)


def make_forward(weight, bias):
    """Build the forward once: all operand shaping happens here (init time)."""
    # torch stores Linear weight as (out=M, in=K); pre-transpose once and pack
    # bias as an extra row -> single (K+1, M) operand, one DMA at call time.
    wb = jnp.concatenate([jnp.asarray(weight.T), bias.reshape(1, -1)], axis=0)  # (3, M)

    # TODO(synk): the PyTorch reference is shape-invalid as written
    # (view(12) on 24 elements, then Linear(2,3) on a 12-vector); we implement
    # the nearest valid semantics: flatten to (-1, 2) and apply the Linear over
    # the last dim -> output (12, 3).
    @jax.jit
    def forward(x):
        x2d = x.reshape(-1, 2)                # (12, 2)
        return pallas_linear_k2(x2d, wb)      # (12, 3)

    return forward


if __name__ == "__main__":
    key = jax.random.PRNGKey(0)
    kx, kw, kb = jax.random.split(key, 3)

    # Input shape implied by the module: (4, 3, 2)
    x = jax.random.normal(kx, (4, 3, 2), dtype=jnp.float32)

    # nn.Linear(2, 3): torch stores weight as (out=3, in=2), bias (3,).
    weight = jax.random.normal(kw, (3, 2), dtype=jnp.float32) * 0.5
    bias = jax.random.normal(kb, (3,), dtype=jnp.float32) * 0.1

    forward = make_forward(weight, bias)      # packing/transpose done once here
    out = jax.block_until_ready(forward(x))

    # Cross-check against plain JAX reference of the same (valid) semantics.
    ref = x.reshape(-1, 2) @ weight.T + bias
    assert out.shape == (12, 3), out.shape
    assert jnp.allclose(out, ref, atol=1e-5, rtol=1e-5)

    print("KERNEL_OK")
</pallas_src>

<mosaic_0001>
module attributes {stable_mosaic.version = 11 : i64} {
  func.func @linear_k2_kernel(%arg0: memref<12x2xf32, #tpu.memory_space<vmem>>, %arg1: memref<3x3xf32, #tpu.memory_space<vmem>>, %arg2: memref<12x3xf32, #tpu.memory_space<vmem>>) attributes {dimension_semantics = [], scalar_prefetch = 0 : i64, scratch_operands = 0 : i64, tpu.core_type = #tpu.core_type<tc>} {
    %c0 = arith.constant 0 : index
    %c0_0 = arith.constant 0 : index
    %0 = vector.load %arg0[%c0, %c0_0] : memref<12x2xf32, #tpu.memory_space<vmem>>, vector<12x1xf32>
    %c0_1 = arith.constant 0 : index
    %c1 = arith.constant 1 : index
    %1 = vector.load %arg0[%c0_1, %c1] : memref<12x2xf32, #tpu.memory_space<vmem>>, vector<12x1xf32>
    %c0_2 = arith.constant 0 : index
    %c0_3 = arith.constant 0 : index
    %2 = vector.load %arg1[%c0_2, %c0_3] : memref<3x3xf32, #tpu.memory_space<vmem>>, vector<1x3xf32>
    %c1_4 = arith.constant 1 : index
    %c0_5 = arith.constant 0 : index
    %3 = vector.load %arg1[%c1_4, %c0_5] : memref<3x3xf32, #tpu.memory_space<vmem>>, vector<1x3xf32>
    %c2 = arith.constant 2 : index
    %c0_6 = arith.constant 0 : index
    %4 = vector.load %arg1[%c2, %c0_6] : memref<3x3xf32, #tpu.memory_space<vmem>>, vector<1x3xf32>
    %5 = vector.broadcast %0 : vector<12x1xf32> to vector<12x3xf32>
    %6 = vector.broadcast %2 : vector<1x3xf32> to vector<12x3xf32>
    %7 = arith.mulf %5, %6 : vector<12x3xf32>
    %8 = vector.broadcast %1 : vector<12x1xf32> to vector<12x3xf32>
    %9 = vector.broadcast %3 : vector<1x3xf32> to vector<12x3xf32>
    %10 = arith.mulf %8, %9 : vector<12x3xf32>
    %11 = arith.addf %7, %10 : vector<12x3xf32>
    %12 = vector.broadcast %4 : vector<1x3xf32> to vector<12x3xf32>
    %13 = arith.addf %11, %12 : vector<12x3xf32>
    %c0_7 = arith.constant 0 : index
    %c0_8 = arith.constant 0 : index
    %14 = vector.load %arg2[%c0_7, %c0_8] : memref<12x3xf32, #tpu.memory_space<vmem>>, vector<12x3xf32>
    tpu.vector_store %arg2[%c0_7, %c0_8], %13 {strides = array<i32>} : memref<12x3xf32, #tpu.memory_space<vmem>>, vector<12x3xf32>,
    return
  }
}

</mosaic_0001>

<bundles_post_ra>
// kernel: forward.1
= control target key start
LH: loop header
LB: loop body
LE: loop exit
PB: predicated region body
PF: predicated region fallthrough
CT: control target
= control target key end

     0   :  { %v70_v0 = vmov 1   ;;  %v71_v1 = vmov 0   ;;  %vm54_vm0 = vcmask 23552   ;;  %vm56_vm1 = vcmask 19456   ;;  %s108_s0 = inlined_call_operand.vmem [shape: f32[12,2], index: 0, kind: input, shape index: {}]   ;;  %s109_s1 = inlined_call_operand.vmem [shape: f32[3,3], index: 1, kind: input, shape index: {}]   ;;  %s110_s2 = inlined_call_operand.vmem [shape: f32[12,3], index: 2, kind: output, shape index: {}]  }
   0x1   :  { %68 = vset.pattern.permute.xlu1 %v70_v0  ;;  %67 = vset.pattern.permute.xlu0 %v71_v1  ;;  %v11_v2 = vld [vmem:[%s108_s0] sm:$0xff]  ;;  %v12_v3 = vld [vmem:[%s108_s0 + $0x8] sm:$0xf] }
   0x2   :  { %33 = vperm.xlu1 %68, %v11_v2   ;;  %18 = vperm.xlu0 %67, %v11_v2   ;;  %v63_v4 = vld [vmem:[%s109_s1 + $0x1] ss:$0 sm:$0xff]  ;;  %v62_v5 = vld [vmem:[%s109_s1] ss:$0 sm:$0xff]  ;;  %v64_v10 = vld [vmem:[%s109_s1 + $0x2] ss:$0 sm:$0xff] }
   0x6   :  { %37 = vperm.xlu1 %68, %v12_v3   ;;  %23 = vperm.xlu0 %67, %v12_v3  }
   0xa   :  { %69 = vset.pattern.permute.xlu0 %v70_v0 }
  0x7d   :  { %v34_v6 = vpop.permute.xlu1 %33  ;;  %v19_v7 = vpop.permute.xlu0 %18 }
  0x7e   :  { %v44_v8 = vmul.f32 %v63_v4, %v34_v6  ;;  %v30_v9 = vmul.f32 %v62_v5, %v19_v7 }
  0x80   :  { %v46_v11 = vadd.f32 %v44_v8, %v30_v9 }
  0x81   :  { %v38_v12 = vpop.permute.xlu1 %37  ;;  %v24_v13 = vpop.permute.xlu0 %23 }
  0x82   :  { %v52_v14 = vadd.f32 %v64_v10, %v46_v11  ;;  %v45_v15 = vmul.f32 %v63_v4, %v38_v12  ;;  %v31_v16 = vmul.f32 %v62_v5, %v24_v13 }
  0x84   :  { %55 = vst.msk [vmem:[%s110_s2] sm:$0xff] %vm54_vm0, %v52_v14  ;;  %v47_v17 = vadd.f32 %v45_v15, %v31_v16 }
  0x86   :  { %v53_v18 = vadd.f32 %v64_v10, %v47_v17 }
  0x88   :  { %57 = vst.msk [vmem:[%s110_s2 + $0x8] sm:$0xf] %vm56_vm1, %v53_v18 }

</bundles_post_ra>
